<compile_context>
chip_gen: v7x
topology: tpu7x:2x2x1
jax: 0.10.0
libtpu: 0.0.40
codegen_flags: <defaults>
</compile_context>

<pallas_src>
import functools
import math

import jax
import jax.numpy as jnp
import numpy as np
from jax.experimental import pallas as pl
from jax.experimental.pallas import tpu as pltpu


def _mha_kernel(xq_ref, xk_ref, xv_ref, bias_ref,
                wq_ref, bq_ref, wk_ref, bk_ref, wv_ref, bv_ref,
                wo_ref, bo_ref, cos_ref, sin_ref, o_ref,
                *, heads, d_k, d_model):
    f32 = jnp.float32
    bf16 = jnp.bfloat16
    D = d_model

    xq = xq_ref[...]                       # (N, D) bf16, N = B*S
    xk = xk_ref[...]
    xv = xv_ref[...]

    # Fused full-width projections: one MXU matmul each, f32 accumulation.
    # Wq/Wk columns are [rotate-half-permuted | pre-rolled] (built in wrapper),
    # so the RoPE "rotate-half" term is just the second half of the output.
    # 1/sqrt(d_k) is already folded into wq/bq.
    qa = jnp.dot(xq, wq_ref[...], preferred_element_type=f32) + bq_ref[...]   # (N, 2D)
    ka = jnp.dot(xk, wk_ref[...], preferred_element_type=f32) + bk_ref[...]   # (N, 2D)
    vp = jnp.dot(xv, wv_ref[...], preferred_element_type=f32) + bv_ref[...]   # (N, D)

    # RoPE, full width, f32 elementwise (sign already folded into sin table).
    cos = cos_ref[...]                     # (N, D) f32
    sin = sin_ref[...]                     # (N, D) f32
    qh = qa[:, :D] * cos + qa[:, D:] * sin
    kh = ka[:, :D] * cos + ka[:, D:] * sin

    # Head-batched attention over all B*S rows at once; cross-batch (and
    # key-masked) pairs are killed by the additive bias table (exp(-1e9) == 0
    # in f32, so the per-batch softmax is exact).
    q3 = jnp.stack([qh[:, h * d_k:(h + 1) * d_k] for h in range(heads)],
                   axis=0).astype(bf16)    # (H, N, d_k)
    k3 = jnp.stack([kh[:, h * d_k:(h + 1) * d_k] for h in range(heads)],
                   axis=0).astype(bf16)
    v3 = jnp.stack([vp[:, h * d_k:(h + 1) * d_k] for h in range(heads)],
                   axis=0).astype(bf16)

    s = jnp.einsum('hqd,hkd->hqk', q3, k3, preferred_element_type=f32)  # (H, N, N)
    s = s + bias_ref[...][None]            # hoisted additive mask bias
    m = jnp.max(s, axis=-1, keepdims=True)
    e = jnp.exp(s - m)
    p = e * pl.reciprocal(jnp.sum(e, axis=-1, keepdims=True), approx=True)
    # TODO(synk): attention-prob dropout (training mode) not implemented.

    ctx = jnp.einsum('hqk,hkd->hqd', p.astype(bf16), v3,
                     preferred_element_type=f32)                        # (H, N, d_k)

    # Single output-projection contraction: concat heads back to (N, D) and do
    # one [N,D]x[D,D] matmul (no per-head out matmul + cross-head sum).
    ctx2 = jnp.concatenate([ctx[h] for h in range(heads)], axis=-1).astype(bf16)
    out = jnp.dot(ctx2, wo_ref[...], preferred_element_type=f32) + bo_ref[...]
    o_ref[...] = out.astype(o_ref.dtype)


def multi_head_attention(q, k, v, mask, params, *, heads):
    B, S, D = q.shape
    d_k = D // heads
    half = d_k // 2
    N = B * S
    f32 = jnp.float32
    bf16 = jnp.bfloat16
    scale = 1.0 / math.sqrt(d_k)

    # Per-head column permutations (trace-time numpy):
    #   perm: within each head reorder outputs to rotate-half layout
    #         [even pair components..., odd pair components...]
    #   roll: within each head swap the two halves (the "rotate-half" source).
    base = np.concatenate([np.arange(0, d_k, 2), np.arange(1, d_k, 2)])
    perm = np.concatenate([h * d_k + base for h in range(heads)])
    roll = np.concatenate([h * d_k + (np.arange(d_k) + half) % d_k
                           for h in range(heads)])

    def rope_proj(wname, bname, s):
        # torch Linear: y = x @ W.T + b  ->  projection matrix is W.T (D_in, D_out)
        wt = jnp.asarray(params[wname]).T[:, perm] * s          # (D, D), permuted (+scaled)
        b = jnp.asarray(params[bname])[perm] * s                # (D,)
        w_cat = jnp.concatenate([wt, wt[:, roll]], axis=1).astype(bf16)       # (D, 2D)
        b_cat = jnp.concatenate([b, b[roll]]).reshape(1, 2 * D).astype(f32)   # (1, 2D)
        return w_cat, b_cat

    wq_cat, bq_cat = rope_proj("wq", "bq", scale)   # 1/sqrt(d_k) folded into Q
    wk_cat, bk_cat = rope_proj("wk", "bk", 1.0)

    wv = jnp.asarray(params["wv"]).T.astype(bf16)               # (D, D)
    bv = jnp.asarray(params["bv"]).reshape(1, D).astype(f32)
    wo = jnp.asarray(params["wo"]).T.astype(bf16)               # (D, D)
    bo = jnp.asarray(params["bo"]).reshape(1, D).astype(f32)

    # RoPE tables in rotate-half layout, tiled over heads and batch: (N, D).
    # (Kept f32 so the same kernel is correct on v5e; v6e/v7x could use bf16.)
    theta = 1.0 / (10000.0 ** (jnp.arange(0, d_k, 2)[:half].astype(f32) / d_k))
    ang = jnp.outer(jnp.arange(S, dtype=f32), theta)            # (S, half)
    cos_h = jnp.concatenate([jnp.cos(ang), jnp.cos(ang)], axis=-1)   # (S, d_k)
    sin_h = jnp.concatenate([-jnp.sin(ang), jnp.sin(ang)], axis=-1)  # sign folded in
    cos_t = jnp.tile(cos_h, (B, heads)).astype(f32)             # (N, D)
    sin_t = jnp.tile(sin_h, (B, heads)).astype(f32)

    # Additive attention bias: key-padding mask + cross-batch blocking (rows of
    # different batch elements are packed together, so off-batch pairs get -1e9).
    key_ok = (mask[:, 0, :] != 0)                               # (B, S)
    same_b = jnp.eye(B, dtype=bool)                             # (B, B)
    allow = jnp.logical_and(same_b[:, None, :, None], key_ok[None, None, :, :])
    allow = jnp.broadcast_to(allow, (B, S, B, S)).reshape(N, N)
    bias_tbl = jnp.where(allow, 0.0, -1e9).astype(f32)          # (N, N)

    # Activations: cast to bf16 at the boundary (halves streaming HBM bytes).
    xq = q.reshape(N, D).astype(bf16)
    xk = k.reshape(N, D).astype(bf16)
    xv = v.reshape(N, D).astype(bf16)

    kernel = functools.partial(_mha_kernel, heads=heads, d_k=d_k, d_model=D)
    vmem = lambda: pl.BlockSpec(memory_space=pltpu.MemorySpace.VMEM)

    out = pl.pallas_call(
        kernel,
        out_shape=jax.ShapeDtypeStruct((N, D), jnp.float32),
        in_specs=[vmem() for _ in range(14)],
        out_specs=vmem(),
        compiler_params=pltpu.CompilerParams(vmem_limit_bytes=32 * 1024 * 1024),
    )(xq, xk, xv, bias_tbl,
      wq_cat, bq_cat, wk_cat, bk_cat, wv, bv, wo, bo, cos_t, sin_t)

    return out.reshape(B, S, D)


# ----------------------- pure-JAX reference (mirrors PyTorch) ----------------
def ref_forward(q, k, v, mask, params, heads):
    B, S, D = q.shape
    d_k = D // heads

    def lin(x, w, b):
        return x @ w.T + b

    qp = lin(q, params["wq"], params["bq"]).reshape(B, S, heads, d_k)
    kp = lin(k, params["wk"], params["bk"]).reshape(B, S, heads, d_k)
    vp = lin(v, params["wv"], params["bv"]).reshape(B, S, heads, d_k)

    half = d_k // 2
    theta = 1.0 / (10000.0 ** (jnp.arange(0, d_k, 2)[:half].astype(jnp.float32) / d_k))
    idx_theta = jnp.outer(jnp.arange(S, dtype=jnp.float32), theta)
    cache = jnp.stack([jnp.cos(idx_theta), jnp.sin(idx_theta)], -1)   # [S, half, 2]

    def rope(x):
        xs = x.reshape(B, S, heads, half, 2)
        rc = cache.reshape(1, S, 1, half, 2)
        out = jnp.stack(
            [xs[..., 0] * rc[..., 0] - xs[..., 1] * rc[..., 1],
             xs[..., 1] * rc[..., 0] + xs[..., 0] * rc[..., 1]], -1)
        return out.reshape(B, S, heads, d_k)

    qp = rope(qp).transpose(0, 2, 1, 3)
    kp = rope(kp).transpose(0, 2, 1, 3)
    vp = vp.transpose(0, 2, 1, 3)

    scores = qp @ kp.transpose(0, 1, 3, 2) / math.sqrt(d_k)
    m = mask[:, None, :, :]                   # [B,1,1,S]
    scores = jnp.where(m == 0, -1e9, scores)
    probs = jax.nn.softmax(scores, axis=-1)
    out = (probs @ vp).transpose(0, 2, 1, 3).reshape(B, S, D)
    return out @ params["wo"].T + params["bo"]


if __name__ == "__main__":
    B, S, D, H = 2, 8, 32, 4

    key = jax.random.PRNGKey(0)
    keys = jax.random.split(key, 11)
    q = jax.random.normal(keys[0], (B, S, D), jnp.float32)
    k = jax.random.normal(keys[1], (B, S, D), jnp.float32)
    v = jax.random.normal(keys[2], (B, S, D), jnp.float32)
    # mask: [B, 1, S]; second batch element has the last 2 positions masked out.
    mask = jnp.ones((B, 1, S), jnp.float32).at[1, 0, S - 2:].set(0.0)

    params = {
        "wq": 0.1 * jax.random.normal(keys[3], (D, D), jnp.float32),
        "bq": 0.1 * jax.random.normal(keys[4], (D,), jnp.float32),
        "wk": 0.1 * jax.random.normal(keys[5], (D, D), jnp.float32),
        "bk": 0.1 * jax.random.normal(keys[6], (D,), jnp.float32),
        "wv": 0.1 * jax.random.normal(keys[7], (D, D), jnp.float32),
        "bv": 0.1 * jax.random.normal(keys[8], (D,), jnp.float32),
        "wo": 0.1 * jax.random.normal(keys[9], (D, D), jnp.float32),
        "bo": 0.1 * jax.random.normal(keys[10], (D,), jnp.float32),
    }

    out = multi_head_attention(q, k, v, mask, params, heads=H)
    out = jax.block_until_ready(out)

    ref = jax.block_until_ready(ref_forward(q, k, v, mask, params, H))
    # bf16 MXU inputs (f32 accumulation) vs full-f32 reference -> loosened
    # tolerance relative to a pure-f32 implementation.
    np.testing.assert_allclose(np.asarray(out), np.asarray(ref),
                               rtol=3e-2, atol=3e-2)
    print("KERNEL_OK")
</pallas_src>

<mosaic_0001>
module attributes {stable_mosaic.version = 11 : i64} {
  func.func @_mha_kernel(%arg0: memref<16x32xbf16, #tpu.memory_space<vmem>>, %arg1: memref<16x32xbf16, #tpu.memory_space<vmem>>, %arg2: memref<16x32xbf16, #tpu.memory_space<vmem>>, %arg3: memref<16x16xf32, #tpu.memory_space<vmem>>, %arg4: memref<32x64xbf16, #tpu.memory_space<vmem>>, %arg5: memref<1x64xf32, #tpu.memory_space<vmem>>, %arg6: memref<32x64xbf16, #tpu.memory_space<vmem>>, %arg7: memref<1x64xf32, #tpu.memory_space<vmem>>, %arg8: memref<32x32xbf16, #tpu.memory_space<vmem>>, %arg9: memref<1x32xf32, #tpu.memory_space<vmem>>, %arg10: memref<32x32xbf16, #tpu.memory_space<vmem>>, %arg11: memref<1x32xf32, #tpu.memory_space<vmem>>, %arg12: memref<16x32xf32, #tpu.memory_space<vmem>>, %arg13: memref<16x32xf32, #tpu.memory_space<vmem>>, %arg14: memref<16x32xf32, #tpu.memory_space<vmem>>) attributes {dimension_semantics = [], scalar_prefetch = 0 : i64, scratch_operands = 0 : i64, tpu.core_type = #tpu.core_type<tc>} {
    %c0 = arith.constant 0 : index
    %c0_0 = arith.constant 0 : index
    %0 = vector.load %arg0[%c0, %c0_0] : memref<16x32xbf16, #tpu.memory_space<vmem>>, vector<16x32xbf16>
    %c0_1 = arith.constant 0 : index
    %c0_2 = arith.constant 0 : index
    %1 = vector.load %arg1[%c0_1, %c0_2] : memref<16x32xbf16, #tpu.memory_space<vmem>>, vector<16x32xbf16>
    %c0_3 = arith.constant 0 : index
    %c0_4 = arith.constant 0 : index
    %2 = vector.load %arg2[%c0_3, %c0_4] : memref<16x32xbf16, #tpu.memory_space<vmem>>, vector<16x32xbf16>
    %c0_5 = arith.constant 0 : index
    %c0_6 = arith.constant 0 : index
    %3 = vector.load %arg4[%c0_5, %c0_6] : memref<32x64xbf16, #tpu.memory_space<vmem>>, vector<32x64xbf16>
    %cst = arith.constant dense<0.000000e+00> : vector<16x64xf32>
    %4 = tpu.matmul %0, %3, %cst {dimension_numbers = #tpu.dot_dimension_numbers<[1], [0], [0], [1], [0, 0, 1, 1], [], []>} : vector<16x32xbf16>, vector<32x64xbf16>, vector<16x64xf32> -> vector<16x64xf32>
    %c0_7 = arith.constant 0 : index
    %c0_8 = arith.constant 0 : index
    %5 = vector.load %arg5[%c0_7, %c0_8] : memref<1x64xf32, #tpu.memory_space<vmem>>, vector<1x64xf32>
    %6 = vector.broadcast %5 : vector<1x64xf32> to vector<16x64xf32>
    %7 = arith.addf %4, %6 : vector<16x64xf32>
    %c0_9 = arith.constant 0 : index
    %c0_10 = arith.constant 0 : index
    %8 = vector.load %arg6[%c0_9, %c0_10] : memref<32x64xbf16, #tpu.memory_space<vmem>>, vector<32x64xbf16>
    %cst_11 = arith.constant dense<0.000000e+00> : vector<16x64xf32>
    %9 = tpu.matmul %1, %8, %cst_11 {dimension_numbers = #tpu.dot_dimension_numbers<[1], [0], [0], [1], [0, 0, 1, 1], [], []>} : vector<16x32xbf16>, vector<32x64xbf16>, vector<16x64xf32> -> vector<16x64xf32>
    %c0_12 = arith.constant 0 : index
    %c0_13 = arith.constant 0 : index
    %10 = vector.load %arg7[%c0_12, %c0_13] : memref<1x64xf32, #tpu.memory_space<vmem>>, vector<1x64xf32>
    %11 = vector.broadcast %10 : vector<1x64xf32> to vector<16x64xf32>
    %12 = arith.addf %9, %11 : vector<16x64xf32>
    %c0_14 = arith.constant 0 : index
    %c0_15 = arith.constant 0 : index
    %13 = vector.load %arg8[%c0_14, %c0_15] : memref<32x32xbf16, #tpu.memory_space<vmem>>, vector<32x32xbf16>
    %cst_16 = arith.constant dense<0.000000e+00> : vector<16x32xf32>
    %14 = tpu.matmul %2, %13, %cst_16 {dimension_numbers = #tpu.dot_dimension_numbers<[1], [0], [0], [1], [0, 0, 1, 1], [], []>} : vector<16x32xbf16>, vector<32x32xbf16>, vector<16x32xf32> -> vector<16x32xf32>
    %c0_17 = arith.constant 0 : index
    %c0_18 = arith.constant 0 : index
    %15 = vector.load %arg9[%c0_17, %c0_18] : memref<1x32xf32, #tpu.memory_space<vmem>>, vector<1x32xf32>
    %16 = vector.broadcast %15 : vector<1x32xf32> to vector<16x32xf32>
    %17 = arith.addf %14, %16 : vector<16x32xf32>
    %c0_19 = arith.constant 0 : index
    %c0_20 = arith.constant 0 : index
    %18 = vector.load %arg12[%c0_19, %c0_20] : memref<16x32xf32, #tpu.memory_space<vmem>>, vector<16x32xf32>
    %c0_21 = arith.constant 0 : index
    %c0_22 = arith.constant 0 : index
    %19 = vector.load %arg13[%c0_21, %c0_22] : memref<16x32xf32, #tpu.memory_space<vmem>>, vector<16x32xf32>
    %20 = vector.extract_strided_slice %7 {offsets = [0, 0], sizes = [16, 32], strides = [1, 1]} : vector<16x64xf32> to vector<16x32xf32>
    %21 = arith.mulf %20, %18 : vector<16x32xf32>
    %22 = vector.extract_strided_slice %7 {offsets = [0, 32], sizes = [16, 32], strides = [1, 1]} : vector<16x64xf32> to vector<16x32xf32>
    %23 = arith.mulf %22, %19 : vector<16x32xf32>
    %24 = arith.addf %21, %23 : vector<16x32xf32>
    %25 = vector.extract_strided_slice %12 {offsets = [0, 0], sizes = [16, 32], strides = [1, 1]} : vector<16x64xf32> to vector<16x32xf32>
    %26 = arith.mulf %25, %18 : vector<16x32xf32>
    %27 = vector.extract_strided_slice %12 {offsets = [0, 32], sizes = [16, 32], strides = [1, 1]} : vector<16x64xf32> to vector<16x32xf32>
    %28 = arith.mulf %27, %19 : vector<16x32xf32>
    %29 = arith.addf %26, %28 : vector<16x32xf32>
    %30 = vector.extract_strided_slice %24 {offsets = [0, 0], sizes = [16, 8], strides = [1, 1]} : vector<16x32xf32> to vector<16x8xf32>
    %31 = vector.extract_strided_slice %24 {offsets = [0, 8], sizes = [16, 8], strides = [1, 1]} : vector<16x32xf32> to vector<16x8xf32>
    %32 = vector.extract_strided_slice %24 {offsets = [0, 16], sizes = [16, 8], strides = [1, 1]} : vector<16x32xf32> to vector<16x8xf32>
    %33 = vector.extract_strided_slice %24 {offsets = [0, 24], sizes = [16, 8], strides = [1, 1]} : vector<16x32xf32> to vector<16x8xf32>
    %34 = vector.shape_cast %30 : vector<16x8xf32> to vector<1x16x8xf32>
    %35 = vector.shape_cast %31 : vector<16x8xf32> to vector<1x16x8xf32>
    %36 = vector.shape_cast %32 : vector<16x8xf32> to vector<1x16x8xf32>
    %37 = vector.shape_cast %33 : vector<16x8xf32> to vector<1x16x8xf32>
    %38 = tpu.concatenate %34, %35, %36, %37 in 0 : vector<1x16x8xf32>, vector<1x16x8xf32>, vector<1x16x8xf32>, vector<1x16x8xf32> -> vector<4x16x8xf32>
    %39 = arith.truncf %38 : vector<4x16x8xf32> to vector<4x16x8xbf16>
    %40 = vector.extract_strided_slice %29 {offsets = [0, 0], sizes = [16, 8], strides = [1, 1]} : vector<16x32xf32> to vector<16x8xf32>
    %41 = vector.extract_strided_slice %29 {offsets = [0, 8], sizes = [16, 8], strides = [1, 1]} : vector<16x32xf32> to vector<16x8xf32>
    %42 = vector.extract_strided_slice %29 {offsets = [0, 16], sizes = [16, 8], strides = [1, 1]} : vector<16x32xf32> to vector<16x8xf32>
    %43 = vector.extract_strided_slice %29 {offsets = [0, 24], sizes = [16, 8], strides = [1, 1]} : vector<16x32xf32> to vector<16x8xf32>
    %44 = vector.shape_cast %40 : vector<16x8xf32> to vector<1x16x8xf32>
    %45 = vector.shape_cast %41 : vector<16x8xf32> to vector<1x16x8xf32>
    %46 = vector.shape_cast %42 : vector<16x8xf32> to vector<1x16x8xf32>
    %47 = vector.shape_cast %43 : vector<16x8xf32> to vector<1x16x8xf32>
    %48 = tpu.concatenate %44, %45, %46, %47 in 0 : vector<1x16x8xf32>, vector<1x16x8xf32>, vector<1x16x8xf32>, vector<1x16x8xf32> -> vector<4x16x8xf32>
    %49 = arith.truncf %48 : vector<4x16x8xf32> to vector<4x16x8xbf16>
    %50 = vector.extract_strided_slice %17 {offsets = [0, 0], sizes = [16, 8], strides = [1, 1]} : vector<16x32xf32> to vector<16x8xf32>
    %51 = vector.extract_strided_slice %17 {offsets = [0, 8], sizes = [16, 8], strides = [1, 1]} : vector<16x32xf32> to vector<16x8xf32>
    %52 = vector.extract_strided_slice %17 {offsets = [0, 16], sizes = [16, 8], strides = [1, 1]} : vector<16x32xf32> to vector<16x8xf32>
    %53 = vector.extract_strided_slice %17 {offsets = [0, 24], sizes = [16, 8], strides = [1, 1]} : vector<16x32xf32> to vector<16x8xf32>
    %54 = vector.shape_cast %50 : vector<16x8xf32> to vector<1x16x8xf32>
    %55 = vector.shape_cast %51 : vector<16x8xf32> to vector<1x16x8xf32>
    %56 = vector.shape_cast %52 : vector<16x8xf32> to vector<1x16x8xf32>
    %57 = vector.shape_cast %53 : vector<16x8xf32> to vector<1x16x8xf32>
    %58 = tpu.concatenate %54, %55, %56, %57 in 0 : vector<1x16x8xf32>, vector<1x16x8xf32>, vector<1x16x8xf32>, vector<1x16x8xf32> -> vector<4x16x8xf32>
    %59 = arith.truncf %58 : vector<4x16x8xf32> to vector<4x16x8xbf16>
    "tpu.trace_start"() <{level = 10 : i32, message = "hqd,hkd->hqk"}> : () -> ()
    %cst_23 = arith.constant dense<0.000000e+00> : vector<4x16x16xf32>
    %60 = tpu.matmul %39, %49, %cst_23 {dimension_numbers = #tpu.dot_dimension_numbers<[2], [2], [1], [1], [0, 0, 0, 1, 1, 1], [0], [0]>} : vector<4x16x8xbf16>, vector<4x16x8xbf16>, vector<4x16x16xf32> -> vector<4x16x16xf32>
    "tpu.trace_stop"() : () -> ()
    %c0_24 = arith.constant 0 : index
    %c0_25 = arith.constant 0 : index
    %61 = vector.load %arg3[%c0_24, %c0_25] : memref<16x16xf32, #tpu.memory_space<vmem>>, vector<16x16xf32>
    %62 = vector.shape_cast %61 : vector<16x16xf32> to vector<1x16x16xf32>
    %63 = vector.broadcast %62 : vector<1x16x16xf32> to vector<4x16x16xf32>
    %64 = arith.addf %60, %63 : vector<4x16x16xf32>
    %cst_26 = arith.constant dense<0xFF800000> : vector<4x16xf32>
    %65 = vector.multi_reduction <maximumf>, %64, %cst_26 [2] : vector<4x16x16xf32> to vector<4x16xf32>
    %66 = vector.shape_cast %65 : vector<4x16xf32> to vector<4x16x1xf32>
    %67 = vector.broadcast %66 : vector<4x16x1xf32> to vector<4x16x16xf32>
    %68 = arith.subf %64, %67 : vector<4x16x16xf32>
    %69 = math.exp %68 : vector<4x16x16xf32>
    %cst_27 = arith.constant dense<0.000000e+00> : vector<4x16xf32>
    %70 = vector.multi_reduction <add>, %69, %cst_27 [2] : vector<4x16x16xf32> to vector<4x16xf32>
    %71 = vector.shape_cast %70 : vector<4x16xf32> to vector<4x16x1xf32>
    %72 = tpu.reciprocal %71 {approx = true} : vector<4x16x1xf32> -> vector<4x16x1xf32>
    %73 = vector.broadcast %72 : vector<4x16x1xf32> to vector<4x16x16xf32>
    %74 = arith.mulf %69, %73 : vector<4x16x16xf32>
    %75 = arith.truncf %74 : vector<4x16x16xf32> to vector<4x16x16xbf16>
    "tpu.trace_start"() <{level = 10 : i32, message = "hqk,hkd->hqd"}> : () -> ()
    %cst_28 = arith.constant dense<0.000000e+00> : vector<4x16x8xf32>
    %76 = tpu.matmul %75, %59, %cst_28 {dimension_numbers = #tpu.dot_dimension_numbers<[2], [1], [1], [2], [0, 0, 0, 1, 1, 2], [0], [0]>} : vector<4x16x16xbf16>, vector<4x16x8xbf16>, vector<4x16x8xf32> -> vector<4x16x8xf32>
    "tpu.trace_stop"() : () -> ()
    %77 = vector.extract_strided_slice %76 {offsets = [0, 0, 0], sizes = [1, 16, 8], strides = [1, 1, 1]} : vector<4x16x8xf32> to vector<1x16x8xf32>
    %78 = vector.shape_cast %77 : vector<1x16x8xf32> to vector<16x8xf32>
    %79 = vector.extract_strided_slice %76 {offsets = [1, 0, 0], sizes = [1, 16, 8], strides = [1, 1, 1]} : vector<4x16x8xf32> to vector<1x16x8xf32>
    %80 = vector.shape_cast %79 : vector<1x16x8xf32> to vector<16x8xf32>
    %81 = vector.extract_strided_slice %76 {offsets = [2, 0, 0], sizes = [1, 16, 8], strides = [1, 1, 1]} : vector<4x16x8xf32> to vector<1x16x8xf32>
    %82 = vector.shape_cast %81 : vector<1x16x8xf32> to vector<16x8xf32>
    %83 = vector.extract_strided_slice %76 {offsets = [3, 0, 0], sizes = [1, 16, 8], strides = [1, 1, 1]} : vector<4x16x8xf32> to vector<1x16x8xf32>
    %84 = vector.shape_cast %83 : vector<1x16x8xf32> to vector<16x8xf32>
    %85 = tpu.concatenate %78, %80, %82, %84 in 1 : vector<16x8xf32>, vector<16x8xf32>, vector<16x8xf32>, vector<16x8xf32> -> vector<16x32xf32>
    %86 = arith.truncf %85 : vector<16x32xf32> to vector<16x32xbf16>
    %c0_29 = arith.constant 0 : index
    %c0_30 = arith.constant 0 : index
    %87 = vector.load %arg10[%c0_29, %c0_30] : memref<32x32xbf16, #tpu.memory_space<vmem>>, vector<32x32xbf16>
    %cst_31 = arith.constant dense<0.000000e+00> : vector<16x32xf32>
    %88 = tpu.matmul %86, %87, %cst_31 {dimension_numbers = #tpu.dot_dimension_numbers<[1], [0], [0], [1], [0, 0, 1, 1], [], []>} : vector<16x32xbf16>, vector<32x32xbf16>, vector<16x32xf32> -> vector<16x32xf32>
    %c0_32 = arith.constant 0 : index
    %c0_33 = arith.constant 0 : index
    %89 = vector.load %arg11[%c0_32, %c0_33] : memref<1x32xf32, #tpu.memory_space<vmem>>, vector<1x32xf32>
    %90 = vector.broadcast %89 : vector<1x32xf32> to vector<16x32xf32>
    %91 = arith.addf %88, %90 : vector<16x32xf32>
    %c0_34 = arith.constant 0 : index
    %c0_35 = arith.constant 0 : index
    %92 = vector.load %arg14[%c0_34, %c0_35] : memref<16x32xf32, #tpu.memory_space<vmem>>, vector<16x32xf32>
    tpu.vector_store %arg14[%c0_34, %c0_35], %91 {strides = array<i32>} : memref<16x32xf32, #tpu.memory_space<vmem>>, vector<16x32xf32>,
    return
  }
}

</mosaic_0001>

<bundles_post_ra>
// kernel: tpu_custom_call.1
= control target key start
LH: loop header
LB: loop body
LE: loop exit
PB: predicated region body
PF: predicated region fallthrough
CT: control target
= control target key end

     0   :  { %19 = vsyncpa [#allocation3], 0  ;;  %s2016_s0 = inlined_call_operand.hbm [shape: bf16[16,32], index: 0, kind: input, shape index: {}]   ;;  %s2017_s1 = inlined_call_operand.hbm [shape: bf16[16,32], index: 1, kind: input, shape index: {}]   ;;  %s2018_s2 = inlined_call_operand.hbm [shape: bf16[16,32], index: 2, kind: input, shape index: {}]   ;;  %s2019_s3 = inlined_call_operand.hbm [shape: f32[16,16], index: 3, kind: input, shape index: {}]   ;;  %s2020_s4 = inlined_call_operand.hbm [shape: bf16[32,64], index: 4, kind: input, shape index: {}]   ;;  %s2021_s5 = inlined_call_operand.vmem [shape: f32[1,64], index: 5, kind: input, shape index: {}]   ;;  %s2022_s6 = inlined_call_operand.vmem [shape: bf16[32,64], index: 6, kind: input, shape index: {}]   ;;  %s2023_s7 = inlined_call_operand.hbm [shape: f32[1,64], index: 7, kind: input, shape index: {}]   ;;  %s2024_s8 = inlined_call_operand.hbm [shape: bf16[32,32], index: 8, kind: input, shape index: {}]   ;;  %s2025_s9 = inlined_call_operand.hbm [shape: f32[1,32], index: 9, kind: input, shape index: {}]   ;;  %s2026_s10 = inlined_call_operand.vmem [shape: bf16[32,32], index: 10, kind: input, shape index: {}]   ;;  %s2027_s11 = inlined_call_operand.hbm [shape: f32[1,32], index: 11, kind: input, shape index: {}]   ;;  %s2028_s12 = inlined_call_operand.hbm [shape: f32[16,32], index: 12, kind: input, shape index: {}]   ;;  %s2029_s13 = inlined_call_operand.vmem [shape: f32[16,32], index: 13, kind: input, shape index: {}]   ;;  %s2030_s14 = inlined_call_operand.hbm [shape: f32[16,32], index: 14, kind: output, shape index: {}]  }
   0x1   :  { %20 = vsyncpa [#allocation6], 0 }
   0x2   :  { %21 = vsyncpa [#allocation9], 0 }
   0x3   :  { %22 = vsyncpa [#allocation12], 0 }
   0x4   :  { %23 = vsyncpa [#allocation15], 0 }
   0x5   :  { %24 = vsyncpa [#allocation18], 0 }
   0x6   :  { %25 = vsyncpa [#allocation4], 0  ;;  %s1615_s29 = smov [#allocation5]   ;;  %s1616_s15 = smov [#allocation8]  }
   0x7   :  { %s43_s30 = sshll.u32 %s1615_s29, 4  ;;  %s67_s16 = sshll.u32 %s1616_s15, 4  ;;  %s44_s30 = int_to_ptr.vmem [resolvable:$true] %s43_s30  ;;  %s1714_s16 = int_to_ptr.vmem [resolvable:$true] %s67_s16 }
   0x8   :  { %s1359_s19 = scalar_lea.hbm %s2017_s1, 128 }
   0x9   :  { %p1360_p0 = scmp.ne.s32.totalorder %s2017_s1, %s1359_s19  ;;  %p1363_p1 = scmp.lt.u32.totalorder %s1359_s19, %s2017_s1 }
   0xb   :  { %p1365_p2 = pnand %p1363_p1, %p1360_p0 }
   0xd   :  { %1368 = shalt.err (!%p1365_p2)
}
   0xe   :  { %s1369_s24 = scalar_lea.vmem %s44_s30, 128  ;;  %p1374_p4 = scmp.lt.s32.totalorder %s44_s30, %s44_s30 }
   0xf   :  { %p1370_p3 = scmp.ne.s32.totalorder %s44_s30, %s1369_s24  ;;  %p1375_p5 = scmp.lt.s32.totalorder %s1369_s24, %s1369_s24 }
  0x11   :  { %p1376_p6 = por %p1375_p5, %p1374_p4 }
  0x13   :  { %p1377_p7 = pnand %p1376_p6, %p1370_p3 }
  0x15   :  { %1380 = shalt.err (!%p1377_p7)
}
  0x16   :  { %s2031_s25 = smov 64   ;;  %s1618_s26 = smov 4  }
  0x17   :  { %49 = dma.hbm_to_vmem [thread:$0]  %s2017_s1, 128, %s44_s30, [#allocation6], %s2031_s25, %s2031_s25, %s1618_s26  }
  0x18   :  { %s1381_s17 = scalar_lea.hbm %s2019_s3, 256 }
  0x19   :  { %p1382_p8 = scmp.ne.s32.totalorder %s2019_s3, %s1381_s17  ;;  %p1385_p9 = scmp.lt.u32.totalorder %s1381_s17, %s2019_s3 }
  0x1b   :  { %p1387_p10 = pnand %p1385_p9, %p1382_p8 }
  0x1d   :  { %1390 = shalt.err (!%p1387_p10)
}
  0x1e   :  { %s1391_s22 = scalar_lea.vmem %s1714_s16, 256  ;;  %p1396_p12 = scmp.lt.s32.totalorder %s1714_s16, %s1714_s16 }
  0x1f   :  { %p1392_p11 = scmp.ne.s32.totalorder %s1714_s16, %s1391_s22  ;;  %p1397_p13 = scmp.lt.s32.totalorder %s1391_s22, %s1391_s22 }
  0x21   :  { %p1398_p0 = por %p1397_p13, %p1396_p12 }
  0x23   :  { %p1399_p1 = pnand %p1398_p0, %p1392_p11 }
  0x25   :  { %1402 = shalt.err (!%p1399_p1)
}
  0x26   :  { %s1619_s1 = smov 128   ;;  %s1620_s30 = smov 8  }
  0x27   :  { %73 = dma.hbm_to_vmem [thread:$0]  %s2019_s3, 256, %s1714_s16, [#allocation9], %s1619_s1, %s1619_s1, %s1620_s30  }
  0x28   :  { %s1621_s27 = smov [#allocation11]   ;;  %s1622_s29 = smov [#allocation14]  }
  0x29   :  { %s96_s28 = sshll.u32 %s1621_s27, 4  ;;  %s118_s15 = sshll.u32 %s1622_s29, 4  ;;  %s97_s28 = int_to_ptr.vmem [resolvable:$true] %s96_s28  ;;  %s119_s15 = int_to_ptr.vmem [resolvable:$true] %s118_s15 }
  0x2a   :  { %s1403_s19 = scalar_lea.hbm %s2023_s7, 16 }
  0x2b   :  { %p1404_p2 = scmp.ne.s32.totalorder %s2023_s7, %s1403_s19  ;;  %p1407_p3 = scmp.lt.u32.totalorder %s1403_s19, %s2023_s7 }
  0x2d   :  { %p1409_p4 = pnand %p1407_p3, %p1404_p2 }
  0x2f   :  { %1412 = shalt.err (!%p1409_p4)
}
  0x30   :  { %s1413_s3 = scalar_lea.vmem %s97_s28, 16  ;;  %s1417_s16 = scalar_lea.vmem %s97_s28, 32 }
  0x31   :  { %p1414_p5 = scmp.ne.s32.totalorder %s97_s28, %s1413_s3  ;;  %p1418_p6 = scmp.lt.s32.totalorder %s97_s28, %s97_s28 }
  0x32   :  { %p1419_p7 = scmp.lt.s32.totalorder %s1417_s16, %s1413_s3 }
  0x34   :  { %p1420_p8 = por %p1419_p7, %p1418_p6 }
  0x36   :  { %p1421_p9 = pnand %p1420_p8, %p1414_p5 }
  0x38   :  { %1424 = shalt.err (!%p1421_p9)
}
  0x39   :  { %99 = dma.hbm_to_vmem [thread:$0]  %s2023_s7, 16, %s97_s28, [#allocation12]  }
  0x3a   :  { %s1425_s17 = scalar_lea.hbm %s2025_s9, 16 }
  0x3b   :  { %p1426_p10 = scmp.ne.s32.totalorder %s2025_s9, %s1425_s17  ;;  %p1429_p11 = scmp.lt.u32.totalorder %s1425_s17, %s2025_s9 }
  0x3d   :  { %p1431_p12 = pnand %p1429_p11, %p1426_p10 }
  0x3f   :  { %1434 = shalt.err (!%p1431_p12)
}
  0x40   :  { %s1435_s21 = scalar_lea.vmem %s119_s15, 16  ;;  %s1439_s22 = scalar_lea.vmem %s119_s15, 32 }
  0x41   :  { %p1436_p13 = scmp.ne.s32.totalorder %s119_s15, %s1435_s21  ;;  %p1440_p0 = scmp.lt.s32.totalorder %s119_s15, %s119_s15 }
  0x42   :  { %p1441_p1 = scmp.lt.s32.totalorder %s1439_s22, %s1435_s21 }
  0x44   :  { %p1442_p2 = por %p1441_p1, %p1440_p0 }
  0x46   :  { %p1443_p3 = pnand %p1442_p2, %p1436_p13 }
  0x48   :  { %1446 = shalt.err (!%p1443_p3)
}
  0x49   :  { %121 = dma.hbm_to_vmem [thread:$0]  %s2025_s9, 16, %s119_s15, [#allocation15]  }
  0x4a   :  { %s1623_s3 = smov [#allocation2]   ;;  %s1624_s23 = smov [#allocation7]  }
  0x4b   :  { %s31_s16 = sshll.u32 %s1623_s3, 4  ;;  %s55_s24 = sshll.u32 %s1624_s23, 4  ;;  %s32_s16 = int_to_ptr.vmem [resolvable:$true] %s31_s16  ;;  %s1775_s24 = int_to_ptr.vmem [resolvable:$true] %s55_s24 }
  0x4c   :  { %s1447_s17 = scalar_lea.hbm %s2016_s0, 128 }
  0x4d   :  { %p1448_p4 = scmp.ne.s32.totalorder %s2016_s0, %s1447_s17  ;;  %p1451_p5 = scmp.lt.u32.totalorder %s1447_s17, %s2016_s0 }
  0x4f   :  { %p1453_p6 = pnand %p1451_p5, %p1448_p4 }
  0x51   :  { %1456 = shalt.err (!%p1453_p6)
}
  0x52   :  { %s1457_s9 = scalar_lea.vmem %s32_s16, 128  ;;  %p1462_p8 = scmp.lt.s32.totalorder %s32_s16, %s32_s16 }
  0x53   :  { %p1458_p7 = scmp.ne.s32.totalorder %s32_s16, %s1457_s9  ;;  %p1463_p9 = scmp.lt.s32.totalorder %s1457_s9, %s1457_s9 }
  0x55   :  { %p1464_p10 = por %p1463_p9, %p1462_p8 }
  0x57   :  { %p1465_p11 = pnand %p1464_p10, %p1458_p7 }
  0x59   :  { %1468 = shalt.err (!%p1465_p11)
}
  0x5a   :  { %s2033_s15 = smov 64   ;;  %s1469_s3 = scalar_lea.hbm %s2018_s2, 128 }
  0x5b   :  { %37 = dma.hbm_to_vmem [thread:$0]  %s2016_s0, 128, %s32_s16, [#allocation3], %s2033_s15, %s2033_s15, %s1618_s26  }
  0x5c   :  { %p1470_p12 = scmp.ne.s32.totalorder %s2018_s2, %s1469_s3  ;;  %p1473_p13 = scmp.lt.u32.totalorder %s1469_s3, %s2018_s2 }
  0x5e   :  { %p1475_p0 = pnand %p1473_p13, %p1470_p12 }
  0x60   :  { %1478 = shalt.err (!%p1475_p0)
}
  0x61   :  { %s1479_s25 = scalar_lea.vmem %s1775_s24, 128  ;;  %p1484_p2 = scmp.lt.s32.totalorder %s1775_s24, %s1775_s24 }
  0x62   :  { %p1480_p1 = scmp.ne.s32.totalorder %s1775_s24, %s1479_s25  ;;  %p1485_p3 = scmp.lt.s32.totalorder %s1479_s25, %s1479_s25 }
  0x64   :  { %p1486_p4 = por %p1485_p3, %p1484_p2 }
  0x66   :  { %p1487_p5 = pnand %p1486_p4, %p1480_p1 }
  0x68   :  { %1490 = shalt.err (!%p1487_p5)
}
  0x69   :  { %61 = dma.hbm_to_vmem [thread:$0]  %s2018_s2, 128, %s1775_s24, [#allocation6], %s2033_s15, %s2033_s15, %s1618_s26  }
  0x6a   :  { %s1625_s18 = smov [#allocation10]   ;;  %s1626_s20 = smov [#allocation13]  }
  0x6b   :  { %s79_s19 = sshll.u32 %s1625_s18, 4  ;;  %s105_s9 = sshll.u32 %s1626_s20, 4  ;;  %s80_s19 = int_to_ptr.vmem [resolvable:$true] %s79_s19  ;;  %s1812_s9 = int_to_ptr.vmem [resolvable:$true] %s105_s9 }
  0x6c   :  { %s1491_s7 = scalar_lea.hbm %s2020_s4, 256 }
  0x6d   :  { %p1492_p6 = scmp.ne.s32.totalorder %s2020_s4, %s1491_s7  ;;  %p1495_p7 = scmp.lt.u32.totalorder %s1491_s7, %s2020_s4 }
  0x6f   :  { %p1497_p8 = pnand %p1495_p7, %p1492_p6 }
  0x71   :  { %1500 = shalt.err (!%p1497_p8)
}
  0x72   :  { %s1501_s2 = scalar_lea.vmem %s80_s19, 256  ;;  %p1506_p10 = scmp.lt.s32.totalorder %s80_s19, %s80_s19 }
  0x73   :  { %p1502_p9 = scmp.ne.s32.totalorder %s80_s19, %s1501_s2  ;;  %p1507_p11 = scmp.lt.s32.totalorder %s1501_s2, %s1501_s2 }
  0x75   :  { %p1508_p12 = por %p1507_p11, %p1506_p10 }
  0x77   :  { %p1509_p13 = pnand %p1508_p12, %p1502_p9 }
  0x79   :  { %1512 = shalt.err (!%p1509_p13)
}
  0x7a   :  { %85 = dma.hbm_to_vmem [thread:$0]  %s2020_s4, 256, %s80_s19, [#allocation9], %s2033_s15, %s2033_s15, %s1618_s26  }
  0x7b   :  { %s1513_s0 = scalar_lea.hbm %s2024_s8, 256 }
  0x7c   :  { %p1514_p0 = scmp.ne.s32.totalorder %s2024_s8, %s1513_s0  ;;  %p1517_p1 = scmp.lt.u32.totalorder %s1513_s0, %s2024_s8 }
  0x7e   :  { %p1519_p2 = pnand %p1517_p1, %p1514_p0 }
  0x80   :  { %1522 = shalt.err (!%p1519_p2)
}
  0x81   :  { %s1523_s22 = scalar_lea.vmem %s1812_s9, 256  ;;  %p1528_p4 = scmp.lt.s32.totalorder %s1812_s9, %s1812_s9 }
  0x82   :  { %p1524_p3 = scmp.ne.s32.totalorder %s1812_s9, %s1523_s22  ;;  %p1529_p5 = scmp.lt.s32.totalorder %s1523_s22, %s1523_s22 }
  0x84   :  { %p1530_p6 = por %p1529_p5, %p1528_p4 }
  0x86   :  { %p1531_p7 = pnand %p1530_p6, %p1524_p3 }
  0x88   :  { %1534 = shalt.err (!%p1531_p7)
}
  0x89   :  { %111 = dma.hbm_to_vmem [thread:$0]  %s2024_s8, 256, %s1812_s9, [#allocation12], %s2033_s15, %s2033_s15, %s1618_s26  }
  0x8a   :  { %s1627_s7 = smov [#allocation16]   ;;  %s1628_s3 = smov [#allocation17]  }
  0x8b   :  { %s130_s28 = sshll.u32 %s1627_s7, 4  ;;  %s139_s23 = sshll.u32 %s1628_s3, 4  ;;  %s131_s28 = int_to_ptr.vmem [resolvable:$true] %s130_s28  ;;  %s1849_s23 = int_to_ptr.vmem [resolvable:$true] %s139_s23 }
  0x8c   :  { %s1535_s24 = scalar_lea.hbm %s2027_s11, 16 }
  0x8d   :  { %p1536_p8 = scmp.ne.s32.totalorder %s2027_s11, %s1535_s24  ;;  %p1539_p9 = scmp.lt.u32.totalorder %s1535_s24, %s2027_s11 }
  0x8f   :  { %p1541_p10 = pnand %p1539_p9, %p1536_p8 }
  0x91   :  { %1544 = shalt.err (!%p1541_p10)
}
  0x92   :  { %s1545_s8 = scalar_lea.vmem %s131_s28, 16  ;;  %s1549_s26 = scalar_lea.vmem %s131_s28, 32 }
  0x93   :  { %p1546_p11 = scmp.ne.s32.totalorder %s131_s28, %s1545_s8  ;;  %p1550_p12 = scmp.lt.s32.totalorder %s131_s28, %s131_s28 }
  0x94   :  { %p1551_p13 = scmp.lt.s32.totalorder %s1549_s26, %s1545_s8 }
  0x96   :  { %p1552_p0 = por %p1551_p13, %p1550_p12 }
  0x98   :  { %p1553_p1 = pnand %p1552_p0, %p1546_p11 }
  0x9a   :  { %1556 = shalt.err (!%p1553_p1)
}
  0x9b   :  { %133 = dma.hbm_to_vmem [thread:$0]  %s2027_s11, 16, %s131_s28, [#allocation15]  }
  0x9c   :  { %s1557_s20 = scalar_lea.hbm %s2028_s12, 256 }
  0x9d   :  { %p1558_p2 = scmp.ne.s32.totalorder %s2028_s12, %s1557_s20  ;;  %p1561_p3 = scmp.lt.u32.totalorder %s1557_s20, %s2028_s12 }
  0x9f   :  { %p1563_p4 = pnand %p1561_p3, %p1558_p2 }
  0xa1   :  { %1566 = shalt.err (!%p1563_p4)
}
  0xa2   :  { %s1567_s7 = scalar_lea.vmem %s1849_s23, 256  ;;  %p1572_p6 = scmp.lt.s32.totalorder %s1849_s23, %s1849_s23 }
  0xa3   :  { %p1568_p5 = scmp.ne.s32.totalorder %s1849_s23, %s1567_s7  ;;  %p1573_p7 = scmp.lt.s32.totalorder %s1567_s7, %s1567_s7 }
  0xa5   :  { %p1574_p8 = por %p1573_p7, %p1572_p6 }
  0xa7   :  { %p1575_p9 = pnand %p1574_p8, %p1568_p5 }
  0xa9   :  { %1578 = shalt.err (!%p1575_p9)
}
  0xaa   :  { %145 = dma.hbm_to_vmem [thread:$0]  %s2028_s12, 256, %s1849_s23, [#allocation18], %s1619_s1, %s1619_s1, %s1620_s30  }
  0xab   :  { %1601 = dma.done.wait [#allocation3], 128  }
  0xac   :  { %1602 = vsyncadd [#allocation3], 4294967168 }
  0xad   :  { %1603 = dma.done.wait [#allocation6], 256  }
  0xae   :  { %1604 = vsyncadd [#allocation6], 4294967040 }
  0xaf   :  { %1605 = dma.done.wait [#allocation9], 512  }
  0xb0   :  { %1606 = vsyncadd [#allocation9], 4294966784 }
  0xb1   :  { %1607 = dma.done.wait [#allocation12], 272  }
  0xb2   :  { %1608 = vsyncadd [#allocation12], 4294967024 }
  0xb3   :  { %1609 = dma.done.wait [#allocation15], 32  }
  0xb4   :  { %1610 = vsyncadd [#allocation15], 4294967264 }
  0xb5   :  { %1611 = dma.done.wait [#allocation18], 256  }
  0xb6   :  { %1612 = vsyncadd [#allocation18], 4294967040  ;;  %v1629_v0 = vmov 0.0   ;;  %vm1630_vm0 = vmmov 0   ;;  %v1316_v1 = vld [vmem:[#allocation10] sm:$0xff]   ;;  %v1317_v2 = vld [vmem:[%s2022_s6] sm:$0xff]  }
  0xb7   :  { %1152 = vmatprep.subr.bf16.mxu0 %v1629_v0  ;;  %1160 = vmatprep.subr.bf16.mxu1 %v1629_v0  ;;  %v1318_v3 = vld [vmem:[#allocation10 + $0x8] sm:$0xff]   ;;  %v1319_v4 = vld [vmem:[%s2022_s6 + $0x8] sm:$0xff]   ;;  %v1320_v5 = vld [vmem:[#allocation2] sm:$0xff]   ;;  %vm213_vm1 = vcmask 261120   ;;  %s1631_s25 = smov 32   ;;  %s1632_s0 = smov 96  }
  0xb8   :  { %1156 = vmatprep.mubr.msk.bf16.mxu0 %vm1630_vm0, %v1629_v0  ;;  %1164 = vmatprep.mubr.msk.bf16.mxu1 %vm1630_vm0, %v1629_v0  ;;  %v1321_v6 = vld [vmem:[#allocation5] sm:$0xff]   ;;  %v404_v7 = vld [vmem:[%s2029_s13] sm:$0xff]  ;;  %v405_v8 = vld [vmem:[%s2029_s13 + $0x8] sm:$0xff]  ;;  %vm516_vm2 = vcmask 64512   ;;  %s1634_s8 = smov 112   ;;  %s1635_s26 = smov 104  }
  0xb9   :  { %1153 = vmatpush3.bf16.msra.mxu0 %v1316_v1  ;;  %1161 = vmatpush3.bf16.msra.mxu1 %v1317_v2  ;;  %v1097_v9 = vld [vmem:[%s2021_s5] ss:$0 sm:$0xff]  ;;  %v1102_v11 = vld [vmem:[#allocation11] ss:$0 sm:$0xff]  ;;  %v1322_v28 = vld [vmem:[#allocation13] sm:$0xff]   ;;  %s1633_s5 = smov 120  }
  0xba   :  { %1154 = vmatprep.subr.bf16.mxu0 %v1629_v0  ;;  %1162 = vmatprep.subr.bf16.mxu1 %v1629_v0  ;;  %v1323_v30 = vld [vmem:[#allocation13 + $0x8] sm:$0xff]   ;;  %v1324_v31 = vld [vmem:[#allocation7] sm:$0xff]   ;;  %vm705_vm3 = vcmask 130048   ;;  %s1636_s20 = smov 16   ;;  %s1637_s21 = smov 24   ;;  %vm1002_vm4 = vcmask 195584  }
  0xbb   :  { %410 = vrot.lane.b32.xlu0 %v404_v7, %s1631_s25  ;;  %v402_v32 = vld [vmem:[#allocation17] sm:$0xff]  ;;  %v403_v34 = vld [vmem:[#allocation17 + $0x8] sm:$0xff] }
  0xbd   :  { %1155 = vmatpush3.bf16.msra.mxu0 %v1318_v3  ;;  %1163 = vmatpush3.bf16.msra.mxu1 %v1319_v4 }
  0xbe   :  { %1176 = vmatprep.subr.bf16.mxu1 %v1629_v0  ;;  %1168 = vmatprep.subr.bf16.mxu0 %v1629_v0 }
  0xbf   :  { %412 = vrot.lane.b32.xlu0 %v405_v8, %s1631_s25 }
  0xc0   :  { %1157 = vmatmul.mubr.msk.bf16.vlgmr.msra.gmra.mrb[0].mxu0 %vm213_vm1, %v1320_v5  ;;  %1165 = vmatmul.mubr.msk.bf16.vlgmr.msra.gmra.mrb[0].mxu1 %vm213_vm1, %v1321_v6 }
  0xc1   :  { %1172 = vmatprep.mubr.msk.bf16.mxu0 %vm1630_vm0, %v1629_v0  ;;  %1178 = vmatprep.mubr.msk.bf16.mxu1 %vm1630_vm0, %v1629_v0 }
  0xc2   :  { %1169 = vmatpush3.bf16.msra.mxu0 %v1322_v28 }
  0xc3   :  { %1170 = vmatprep.subr.bf16.mxu0 %v1629_v0 }
  0xc6   :  { %1171 = vmatpush3.bf16.msra.mxu0 %v1323_v30 }
  0xc7   :  { %1182 = vmatprep.subr.bf16.mxu0 %v1629_v0 }
  0xc9   :  { %1173 = vmatmul.mubr.msk.bf16.vlgmr.msra.gmra.mrb[4].mxu0 %vm213_vm1, %v1324_v31 }
  0xca   :  { %1184 = vmatprep.mubr.msk.bf16.mxu0 %vm1630_vm0, %v1629_v0 }
 0x12d   :  { %v411_v10 = vpop.permute.xlu0 %410 }
 0x131   :  { %v413_v25 = vpop.permute.xlu0 %412 }
 0x193   :  { %v251_v12 = vpop.f32.mrb[0].mxu0  ;;  %v323_v14 = vpop.f32.mrb[0].mxu1 }
 0x194   :  { %v252_v13 = vadd.f32 %v1097_v9, %v251_v12  ;;  %v1158_v15 = vpop.f32.mrb[1].mxu0  ;;  %v324_v16 = vadd.f32 %v1102_v11, %v323_v14  ;;  %v1166_v17 = vpop.f32.mrb[1].mxu1 }
 0x195   :  { %v254_v18 = vpop.f32.mrb[2].mxu0  ;;  %v326_v20 = vpop.f32.mrb[2].mxu1  ;;  %v1107_v15 = vld [vmem:[#allocation14] ss:$0 sm:$0xff] }
 0x196   :  { %v416_v19 = vmul.f32 %v411_v10, %v252_v13  ;;  %v1159_v21 = vpop.f32.mrb[3].mxu0  ;;  %v327_v22 = vadd.f32 %v1102_v11, %v326_v20  ;;  %v1167_v23 = vpop.f32.mrb[3].mxu1  ;;  %v430_v24 = vmul.f32 %v411_v10, %v324_v16  ;;  %v255_v27 = vadd.f32 %v1097_v9, %v254_v18 }
 0x197   :  { %v428_v35 = vmul.f32 %v402_v32, %v324_v16  ;;  %v406_v41 = vmul.f32 %v402_v32, %v252_v13 }
 0x198   :  { %420 = vrot.lane.b32.xlu0 %v416_v19, %s1632_s0  ;;  %434 = vrot.lane.b32.xlu1 %v430_v24, %s1632_s0  ;;  %v431_v26 = vmul.f32 %v413_v25, %v327_v22  ;;  %v417_v29 = vmul.f32 %v413_v25, %v255_v27  ;;  %v429_v36 = vmul.f32 %v403_v34, %v327_v22  ;;  %v514_v24 = vld [vmem:[#allocation8] sm:$0xff] }
 0x199   :  { %v407_v42 = vmul.f32 %v403_v34, %v255_v27 }
 0x19c   :  { %436 = vrot.lane.b32.xlu1 %v431_v26, %s1632_s0  ;;  %v395_v16 = vpop.f32.mrb[4].mxu0  ;;  %v515_v26 = vld [vmem:[#allocation8 + $0x8] sm:$0xff] }
 0x19d   :  { %v396_v17 = vadd.f32 %v1107_v15, %v395_v16  ;;  %v1174_v18 = vpop.f32.mrb[5].mxu0 }
 0x19e   :  { %v398_v19 = vpop.f32.mrb[6].mxu0 }
 0x19f   :  { %v399_v20 = vadd.f32 %v1107_v15, %v398_v19  ;;  %v1175_v21 = vpop.f32.mrb[7].mxu0 }
 0x1a0   :  { %422 = vrot.lane.b32.xlu1 %v417_v29, %s1632_s0 }
 0x1a1   :  { %v510_v22 = vpack.c.bf16 %v399_v20, %v396_v17  ;;  %v1945_v23 = vpack.i.bf16 %v399_v20, %v396_v17 }
 0x20a   :  { %v435_v33 = vpop.permute.xlu1 %434  ;;  %v421_v40 = vpop.permute.xlu0 %420 }
 0x20b   :  { %v440_v38 = vadd.f32 %v435_v33, %v428_v35  ;;  %v426_v46 = vadd.f32 %v421_v40, %v406_v41 }
 0x20e   :  { %v437_v37 = vpop.permute.xlu1 %436 }
 0x20f   :  { %v441_v39 = vadd.f32 %v437_v37, %v429_v36 }
 0x211   :  { %v1256_v43 = vpack.i.bf16 %v441_v39, %v440_v38  ;;  %v486_v44 = vpack.c.bf16 %v441_v39, %v440_v38 }
 0x212   :  { %v423_v45 = vpop.permute.xlu1 %422 }
 0x213   :  { %v427_v47 = vadd.f32 %v423_v45, %v407_v42  ;;  %1257 = vrot.lane.b32.xlu0 %v1256_v43, %s1633_s5  ;;  %1262 = vrot.lane.b32.xlu1 %v1256_v43, %s1634_s8  ;;  %v521_v48 = vsel %vm516_vm2, %v486_v44, 0 }
 0x214   :  { %1177 = vmatpush3.bf16.xpose.msra.mxu1 %v521_v48 }
 0x215   :  { %v462_v49 = vpack.c.bf16 %v427_v47, %v426_v46  ;;  %v1266_v50 = vpack.i.bf16 %v427_v47, %v426_v46  ;;  %1188 = vmatprep.subr.bf16.mxu1 %v1629_v0 }
 0x217   :  { %1272 = vrot.lane.b32.xlu1 %v1256_v43, %s1635_s26  ;;  %1267 = vrot.lane.b32.xlu0 %v1266_v50, %s1633_s5 }
 0x21b   :  { %1282 = vrot.lane.b32.xlu1 %v1266_v50, %s1635_s26  ;;  %1277 = vrot.lane.b32.xlu0 %v1266_v50, %s1634_s8 }
 0x21c   :  { %1179 = vmatmul.mubr.msk.bf16.vlgmr.msra.gmra.mrb[4].mxu1 %vm516_vm2, %v462_v49 }
 0x21d   :  { %1190 = vmatprep.mubr.msk.bf16.mxu1 %vm1630_vm0, %v1629_v0 }
 0x285   :  { %v1258_v51 = vpop.permute.xlu0 %1257  ;;  %v1263_v52 = vpop.permute.xlu1 %1262 }
 0x286   :  { %v1260_v53 = vunpack.i.h.bf16 %v1258_v51  ;;  %v1259_v54 = vunpack.i.l.bf16 %v1258_v51  ;;  %v1265_v55 = vunpack.i.h.bf16 %v1263_v52  ;;  %v1264_v56 = vunpack.i.l.bf16 %v1263_v52 }
 0x288   :  { %v487_v57 = vpack.c.bf16 %v1260_v53, %v1259_v54  ;;  %v488_v58 = vpack.c.bf16 %v1265_v55, %v1264_v56 }
 0x289   :  { %v1273_v59 = vpop.permute.xlu1 %1272  ;;  %v1268_v60 = vpop.permute.xlu0 %1267 }
 0x28a   :  { %v1275_v61 = vunpack.i.h.bf16 %v1273_v59  ;;  %v1274_v62 = vunpack.i.l.bf16 %v1273_v59  ;;  %v568_v63 = vsel %vm516_vm2, %v487_v57, 0  ;;  %v615_v1 = vsel %vm516_vm2, %v488_v58, 0 }
 0x28b   :  { %1183 = vmatpush3.bf16.xpose.msra.mxu0 %v568_v63  ;;  %1189 = vmatpush3.bf16.xpose.msra.mxu1 %v615_v1  ;;  %v1270_v2 = vunpack.i.h.bf16 %v1268_v60  ;;  %v1269_v3 = vunpack.i.l.bf16 %v1268_v60 }
 0x28c   :  { %1194 = vmatprep.subr.bf16.mxu0 %v1629_v0  ;;  %1200 = vmatprep.subr.bf16.mxu1 %v1629_v0  ;;  %v489_v7 = vpack.c.bf16 %v1275_v61, %v1274_v62 }
 0x28d   :  { %v1278_v4 = vpop.permute.xlu0 %1277  ;;  %v463_v9 = vpack.c.bf16 %v1270_v2, %v1269_v3  ;;  %v1283_v10 = vpop.permute.xlu1 %1282 }
 0x28e   :  { %v1280_v5 = vunpack.i.h.bf16 %v1278_v4  ;;  %v1279_v6 = vunpack.i.l.bf16 %v1278_v4  ;;  %v662_v11 = vsel %vm516_vm2, %v489_v7, 0  ;;  %v1285_v12 = vunpack.i.h.bf16 %v1283_v10 }
 0x28f   :  { %v1284_v13 = vunpack.i.l.bf16 %v1283_v10 }
 0x290   :  { %v464_v8 = vpack.c.bf16 %v1280_v5, %v1279_v6 }
 0x291   :  { %v465_v14 = vpack.c.bf16 %v1285_v12, %v1284_v13 }
 0x292   :  { %1185 = vmatmul.mubr.msk.bf16.vlgmr.msra.gmra.mrb[8].mxu0 %vm516_vm2, %v463_v9  ;;  %1191 = vmatmul.mubr.msk.bf16.vlgmr.msra.gmra.mrb[8].mxu1 %vm516_vm2, %v464_v8 }
 0x293   :  { %1195 = vmatpush3.bf16.xpose.msra.mxu0 %v662_v11  ;;  %1196 = vmatprep.mubr.msk.bf16.mxu0 %vm1630_vm0, %v1629_v0 }
 0x294   :  { %1206 = vmatprep.subr.bf16.mxu0 %v1629_v0  ;;  %1202 = vmatprep.mubr.msk.bf16.mxu1 %vm1630_vm0, %v1629_v0 }
 0x295   :  { %1201 = vmatpush3.bf16.msra.mxu1 %v510_v22 }
 0x296   :  { %1212 = vmatprep.subr.bf16.mxu1 %v1629_v0 }
 0x29a   :  { %1197 = vmatmul.mubr.msk.bf16.vlgmr.msra.gmra.mrb[12].mxu0 %vm516_vm2, %v465_v14 }
 0x29b   :  { %1208 = vmatprep.mubr.msk.bf16.mxu0 %vm1630_vm0, %v1629_v0 }
 0x2ef   :  { %v557_v25 = vpop.f32.mrb[4].mxu1 }
 0x2f0   :  { %v558_v27 = vadd.f32 %v557_v25, %v514_v24  ;;  %v1180_v28 = vpop.f32.mrb[5].mxu1 }
 0x2f1   :  { %v560_v29 = vpop.f32.mrb[6].mxu1 }
 0x2f2   :  { %v561_v30 = vadd.f32 %v560_v29, %v515_v26  ;;  %v1181_v31 = vpop.f32.mrb[7].mxu1  ;;  %v706_v32 = vsel %vm705_vm3, %v558_v27, -inf }
 0x2f3   :  { %707 = vmax.xlane.f32.xlu0 %v706_v32 }
 0x2f4   :  { %v709_v33 = vsel %vm705_vm3, %v561_v30, -inf }
 0x2f5   :  { %710 = vmax.xlane.f32.xlu1 %v709_v33 }
 0x365   :  { %v604_v34 = vpop.f32.mrb[8].mxu0  ;;  %v651_v35 = vpop.f32.mrb[8].mxu1 }
 0x366   :  { %v605_v36 = vadd.f32 %v604_v34, %v514_v24  ;;  %v652_v37 = vadd.f32 %v651_v35, %v514_v24  ;;  %v1186_v38 = vpop.f32.mrb[9].mxu0  ;;  %v1192_v39 = vpop.f32.mrb[9].mxu1 }
 0x367   :  { %v607_v40 = vpop.f32.mrb[10].mxu0  ;;  %v654_v41 = vpop.f32.mrb[10].mxu1 }
 0x368   :  { %v608_v42 = vadd.f32 %v607_v40, %v515_v26  ;;  %v1187_v43 = vpop.f32.mrb[11].mxu0  ;;  %v1193_v44 = vpop.f32.mrb[11].mxu1  ;;  %v718_v45 = vsel %vm705_vm3, %v652_v37, -inf  ;;  %v712_v46 = vsel %vm705_vm3, %v605_v36, -inf  ;;  %v655_v47 = vadd.f32 %v654_v41, %v515_v26 }
 0x369   :  { %719 = vmax.xlane.f32.xlu1 %v718_v45  ;;  %713 = vmax.xlane.f32.xlu0 %v712_v46 }
 0x36a   :  { %v715_v48 = vsel %vm705_vm3, %v608_v42, -inf  ;;  %v721_v55 = vsel %vm705_vm3, %v655_v47, -inf }
 0x36d   :  { %716 = vmax.xlane.f32.xlu0 %v715_v48  ;;  %v698_v49 = vpop.f32.mrb[12].mxu0 }
 0x36e   :  { %v699_v50 = vadd.f32 %v698_v49, %v514_v24  ;;  %v1198_v51 = vpop.f32.mrb[13].mxu0 }
 0x36f   :  { %v701_v52 = vpop.f32.mrb[14].mxu0 }
 0x370   :  { %v702_v53 = vadd.f32 %v701_v52, %v515_v26  ;;  %v1199_v54 = vpop.f32.mrb[15].mxu0  ;;  %v724_v56 = vsel %vm705_vm3, %v699_v50, -inf }
 0x371   :  { %722 = vmax.xlane.f32.xlu0 %v721_v55  ;;  %725 = vmax.xlane.f32.xlu1 %v724_v56 }
 0x372   :  { %v727_v57 = vsel %vm705_vm3, %v702_v53, -inf }
 0x375   :  { %728 = vmax.xlane.f32.xlu0 %v727_v57 }
 0x380   :  { %v708_v61 = vpop.xlane.xlu0 %707 }
 0x381   :  { %v730_v63 = vsub.f32 %v558_v27, %v708_v61 }
 0x382   :  { %v711_v58 = vpop.xlane.xlu1 %710  ;;  %1287 = vrot.lane.b32.xlu1 %v1945_v23, %s1633_s5 }
 0x383   :  { %v731_v59 = vsub.f32 %v561_v30, %v711_v58  ;;  %v738_v2 = vmul.f32 1.442695, %v730_v63 }
 0x385   :  { %v740_v60 = vmul.f32 1.442695, %v731_v59 }
 0x387   :  { %1327 = vpow2.f32 %v740_v60 }
 0x388   :  { %1329 = vpow2.f32 %v738_v2 }
 0x391   :  { %v1958_v62 = vpop.eup %1327 }
 0x392   :  { %v757_v1 = vsel %vm705_vm3, %v1958_v62, 0.0  ;;  %v1330_v3 = vpop.eup %1329 }
 0x393   :  { %758 = vadd.xlane.f32.xlu0 %v757_v1  ;;  %v754_v4 = vsel %vm705_vm3, %v1330_v3, 0.0 }
 0x3a6   :  { %755 = vadd.xlane.f32.xlu1 %v754_v4 }
 0x3f6   :  { %v720_v5 = vpop.xlane.xlu1 %719  ;;  %v714_v6 = vpop.xlane.xlu0 %713 }
 0x3f7   :  { %v734_v7 = vsub.f32 %v652_v37, %v720_v5  ;;  %v732_v8 = vsub.f32 %v605_v36, %v714_v6 }
 0x3f9   :  { %v742_v9 = vmul.f32 1.442695, %v732_v8  ;;  %v746_v10 = vmul.f32 1.442695, %v734_v7 }
 0x3fa   :  { %v717_v11 = vpop.xlane.xlu0 %716 }
 0x3fb   :  { %v733_v12 = vsub.f32 %v608_v42, %v717_v11  ;;  %1331 = vpow2.f32 %v742_v9 }
 0x3fc   :  { %1333 = vpow2.f32 %v746_v10 }
 0x3fd   :  { %v744_v13 = vmul.f32 1.442695, %v733_v12 }
 0x3fe   :  { %v723_v14 = vpop.xlane.xlu0 %722  ;;  %v726_v15 = vpop.xlane.xlu1 %725 }
 0x3ff   :  { %1335 = vpow2.f32 %v744_v13  ;;  %v735_v16 = vsub.f32 %v655_v47, %v723_v14  ;;  %v736_v17 = vsub.f32 %v699_v50, %v726_v15 }
 0x401   :  { %v748_v18 = vmul.f32 1.442695, %v735_v16  ;;  %v750_v19 = vmul.f32 1.442695, %v736_v17  ;;  %v1325_v16 = vld [vmem:[%s2026_s10] sm:$0xff]  }
 0x402   :  { %v1288_v20 = vpop.permute.xlu1 %1287  ;;  %v729_v21 = vpop.xlane.xlu0 %728 }
 0x403   :  { %1337 = vpow2.f32 %v748_v18  ;;  %v1290_v22 = vunpack.i.h.bf16 %v1288_v20  ;;  %v1289_v24 = vunpack.i.l.bf16 %v1288_v20  ;;  %v737_v25 = vsub.f32 %v702_v53, %v729_v21 }
 0x404   :  { %1339 = vpow2.f32 %v750_v19  ;;  %v1326_v19 = vld [vmem:[%s2026_s10 + $0x8] sm:$0xff]   ;;  %s1638_s10 = smov [#allocation19]  }
 0x405   :  { %v511_v26 = vpack.c.bf16 %v1290_v22, %v1289_v24  ;;  %v752_v27 = vmul.f32 1.442695, %v737_v25  ;;  %v1332_v28 = vpop.eup %1331  ;;  %s1080_s22 = sshll.u32 %s1638_s10, 4  ;;  %s1081_s22 = int_to_ptr.vmem [resolvable:$true] %s1080_s22 }
 0x406   :  { %v760_v29 = vsel %vm705_vm3, %v1332_v28, 0.0  ;;  %v1334_v30 = vpop.eup %1333  ;;  %s1579_s4 = scalar_lea.vmem %s1081_s22, 256  ;;  %p1584_p11 = scmp.lt.s32.totalorder %s1081_s22, %s1081_s22 }
 0x407   :  { %1341 = vpow2.f32 %v752_v27  ;;  %1207 = vmatpush3.bf16.msra.mxu0 %v511_v26  ;;  %761 = vadd.xlane.f32.xlu1 %v760_v29  ;;  %v766_v33 = vsel %vm705_vm3, %v1334_v30, 0.0  ;;  %p1580_p10 = scmp.ne.s32.totalorder %s1081_s22, %s1579_s4  ;;  %p1585_p12 = scmp.lt.s32.totalorder %s1579_s4, %s1579_s4 }
 0x408   :  { %1218 = vmatprep.subr.bf16.mxu0 %v1629_v0 }
 0x409   :  { %v1336_v31 = vpop.eup %1335  ;;  %p1586_p13 = por %p1585_p12, %p1584_p11 }
 0x40a   :  { %v763_v32 = vsel %vm705_vm3, %v1336_v31, 0.0 }
 0x40b   :  { %764 = vadd.xlane.f32.xlu0 %v763_v32  ;;  %767 = vadd.xlane.f32.xlu1 %v766_v33  ;;  %p1587_p0 = pnand %p1586_p13, %p1580_p10 }
 0x40d   :  { %v1338_v34 = vpop.eup %1337 }
 0x40e   :  { %v1340_v35 = vpop.eup %1339  ;;  %v769_v36 = vsel %vm705_vm3, %v1338_v34, 0.0 }
 0x40f   :  { %v772_v37 = vsel %vm705_vm3, %v1340_v35, 0.0  ;;  %770 = vadd.xlane.f32.xlu0 %v769_v36 }
 0x410   :  { %773 = vadd.xlane.f32.xlu1 %v772_v37 }
 0x411   :  { %v1342_v38 = vpop.eup %1341 }
 0x412   :  { %v775_v39 = vsel %vm705_vm3, %v1342_v38, 0.0 }
 0x413   :  { %776 = vadd.xlane.f32.xlu0 %v775_v39 }
 0x420   :  { %v759_v40 = vpop.xlane.xlu0 %758 }
 0x421   :  { %1297 = vrot.lane.b32.xlu1 %v1945_v23, %s1635_s26  ;;  %1343 = vrcp.f32 %v759_v40 }
 0x429   :  { %1292 = vrot.lane.b32.xlu0 %v1945_v23, %s1634_s8 }
 0x42b   :  { %v1344_v42 = vpop.eup %1343 }
 0x42c   :  { %v787_v44 = vmul.f32 %v1344_v42, %v1958_v62 }
 0x433   :  { %v756_v41 = vpop.xlane.xlu1 %755 }
 0x434   :  { %1345 = vrcp.f32 %v756_v41 }
 0x43e   :  { %v1346_v43 = vpop.eup %1345 }
 0x43f   :  { %v786_v45 = vmul.f32 %v1346_v43, %v1330_v3 }
 0x441   :  { %v794_v46 = vpack.c.bf16 %v787_v44, %v786_v45 }
 0x443   :  { %1203 = vmatmul.mubr.msk.bf16.vlgmr.msra.gmra.mrb[12].mxu1 %vm705_vm3, %v794_v46 }
 0x444   :  { %1214 = vmatprep.mubr.msk.bf16.mxu1 %vm1630_vm0, %v1629_v0 }
 0x494   :  { %v762_v47 = vpop.xlane.xlu1 %761 }
 0x495   :  { %1347 = vrcp.f32 %v762_v47 }
 0x498   :  { %v765_v48 = vpop.xlane.xlu0 %764  ;;  %v768_v49 = vpop.xlane.xlu1 %767 }
 0x499   :  { %1349 = vrcp.f32 %v765_v48 }
 0x49a   :  { %1351 = vrcp.f32 %v768_v49  ;;  %v1120_v49 = vld [vmem:[#allocation16] ss:$0 sm:$0xff] }
 0x49c   :  { %v771_v23 = vpop.xlane.xlu0 %770 }
 0x49d   :  { %v774_v50 = vpop.xlane.xlu1 %773  ;;  %1353 = vrcp.f32 %v771_v23 }
 0x49e   :  { %1355 = vrcp.f32 %v774_v50 }
 0x49f   :  { %v1348_v52 = vpop.eup %1347 }
 0x4a0   :  { %v777_v51 = vpop.xlane.xlu0 %776  ;;  %v788_v57 = vmul.f32 %v1348_v52, %v1332_v28 }
 0x4a1   :  { %v1298_v53 = vpop.permute.xlu1 %1297  ;;  %1357 = vrcp.f32 %v777_v51 }
 0x4a2   :  { %v1300_v55 = vunpack.i.h.bf16 %v1298_v53  ;;  %v1299_v56 = vunpack.i.l.bf16 %v1298_v53 }
 0x4a3   :  { %v1350_v54 = vpop.eup %1349 }
 0x4a4   :  { %v789_v58 = vmul.f32 %v1350_v54, %v1336_v31  ;;  %v1293_v59 = vpop.permute.xlu0 %1292  ;;  %v1352_v60 = vpop.eup %1351  ;;  %v513_v2 = vpack.c.bf16 %v1300_v55, %v1299_v56 }
 0x4a5   :  { %v1295_v61 = vunpack.i.h.bf16 %v1293_v59  ;;  %v1294_v62 = vunpack.i.l.bf16 %v1293_v59  ;;  %v790_v4 = vmul.f32 %v1352_v60, %v1334_v30 }
 0x4a6   :  { %v795_v63 = vpack.c.bf16 %v789_v58, %v788_v57 }
 0x4a7   :  { %v1354_v1 = vpop.eup %1353  ;;  %v512_v3 = vpack.c.bf16 %v1295_v61, %v1294_v62 }
 0x4a8   :  { %v791_v5 = vmul.f32 %v1354_v1, %v1338_v34  ;;  %1209 = vmatmul.mubr.msk.bf16.vlgmr.msra.gmra.mrb[16].mxu0 %vm705_vm3, %v795_v63  ;;  %v1356_v6 = vpop.eup %1355 }
 0x4a9   :  { %1219 = vmatpush3.bf16.msra.mxu0 %v513_v2  ;;  %1213 = vmatpush3.bf16.msra.mxu1 %v512_v3  ;;  %v792_v9 = vmul.f32 %v1356_v6, %v1340_v35 }
 0x4aa   :  { %v796_v7 = vpack.c.bf16 %v791_v5, %v790_v4  ;;  %1220 = vmatprep.mubr.msk.bf16.mxu0 %vm1630_vm0, %v1629_v0  ;;  %1224 = vmatprep.subr.bf16.mxu1 %v1629_v0 }
 0x4ab   :  { %v1358_v8 = vpop.eup %1357 }
 0x4ac   :  { %v793_v10 = vmul.f32 %v1358_v8, %v1342_v38  ;;  %1215 = vmatmul.mubr.msk.bf16.vlgmr.msra.gmra.mrb[16].mxu1 %vm705_vm3, %v796_v7 }
 0x4ad   :  { %1228 = vmatprep.mubr.msk.bf16.mxu1 %vm1630_vm0, %v1629_v0  ;;  %1225 = vmatpush3.bf16.msra.mxu1 %v1325_v16 }
 0x4ae   :  { %v797_v11 = vpack.c.bf16 %v793_v10, %v792_v9  ;;  %1226 = vmatprep.subr.bf16.mxu1 %v1629_v0 }
 0x4b0   :  { %1221 = vmatmul.mubr.msk.bf16.vlgmr.msra.gmra.mrb[20].mxu0 %vm705_vm3, %v797_v11 }
 0x4b1   :  { %1227 = vmatpush3.bf16.msra.mxu1 %v1326_v19 }
 0x516   :  { %v835_v12 = vpop.f32.mrb[12].mxu1 }
 0x517   :  { %v1204_v13 = vpop.f32.mrb[13].mxu1 }
 0x518   :  { %v838_v14 = vpop.f32.mrb[14].mxu1 }
 0x519   :  { %v1205_v15 = vpop.f32.mrb[15].mxu1 }
 0x57b   :  { %v879_v17 = vpop.f32.mrb[16].mxu0 }
 0x57c   :  { %v1210_v18 = vpop.f32.mrb[17].mxu0 }
 0x57d   :  { %v882_v20 = vpop.f32.mrb[18].mxu0 }
 0x57e   :  { %v1301_v21 = vpack.i.bf16 %v882_v20, %v879_v17  ;;  %v1211_v22 = vpop.f32.mrb[19].mxu0 }
 0x57f   :  { %v923_v24 = vpop.f32.mrb[16].mxu1 }
 0x580   :  { %v1216_v25 = vpop.f32.mrb[17].mxu1  ;;  %1302 = vrot.lane.b32.xlu1 %v1301_v21, %s1620_s30 }
 0x581   :  { %v926_v26 = vpop.f32.mrb[18].mxu1 }
 0x582   :  { %v1306_v27 = vpack.i.bf16 %v926_v26, %v923_v24  ;;  %v1217_v28 = vpop.f32.mrb[19].mxu1 }
 0x583   :  { %v967_v29 = vpop.f32.mrb[20].mxu0 }
 0x584   :  { %1307 = vrot.lane.b32.xlu0 %v1306_v27, %s1636_s20  ;;  %v1222_v0 = vpop.f32.mrb[21].mxu0 }
 0x585   :  { %v970_v30 = vpop.f32.mrb[22].mxu0 }
 0x586   :  { %v1311_v31 = vpack.i.bf16 %v970_v30, %v967_v29  ;;  %v1223_v32 = vpop.f32.mrb[23].mxu0 }
 0x588   :  { %1312 = vrot.lane.b32.xlu1 %v1311_v31, %s1637_s21 }
 0x5f2   :  { %v1303_v33 = vpop.permute.xlu1 %1302 }
 0x5f3   :  { %v1305_v35 = vunpack.i.h.bf16 %v1303_v33  ;;  %v1304_v36 = vunpack.i.l.bf16 %v1303_v33 }
 0x5f5   :  { %v999_v40 = vsel %vm516_vm2, %v838_v14, %v1305_v35  ;;  %v998_v41 = vsel %vm516_vm2, %v835_v12, %v1304_v36 }
 0x5f6   :  { %v1308_v34 = vpop.permute.xlu0 %1307 }
 0x5f7   :  { %v1310_v37 = vunpack.i.h.bf16 %v1308_v34  ;;  %v1309_v38 = vunpack.i.l.bf16 %v1308_v34 }
 0x5f9   :  { %v1000_v44 = vsel %vm705_vm3, %v998_v41, %v1309_v38  ;;  %v1001_v45 = vsel %vm705_vm3, %v999_v40, %v1310_v37 }
 0x5fa   :  { %v1313_v39 = vpop.permute.xlu1 %1312 }
 0x5fb   :  { %v1315_v42 = vunpack.i.h.bf16 %v1313_v39  ;;  %v1314_v43 = vunpack.i.l.bf16 %v1313_v39 }
 0x5fd   :  { %v1004_v46 = vsel %vm1002_vm4, %v1001_v45, %v1315_v42  ;;  %v1003_v47 = vsel %vm1002_vm4, %v1000_v44, %v1314_v43 }
 0x5fe   :  { %v1005_v48 = vpack.c.bf16 %v1004_v46, %v1003_v47 }
 0x600   :  { %1229 = vmatmul.mubr.msk.bf16.vlgmr.msra.gmra.mrb[20].mxu1 %vm213_vm1, %v1005_v48 }
 0x6d3   :  { %v1066_v23 = vpop.f32.mrb[20].mxu1 }
 0x6d4   :  { %v1067_v50 = vadd.f32 %v1120_v49, %v1066_v23  ;;  %v1230_v51 = vpop.f32.mrb[21].mxu1 }
 0x6d5   :  { %v1069_v52 = vpop.f32.mrb[22].mxu1 }
 0x6d6   :  { %1073 = vst.msk [vmem:[#allocation19] sm:$0xff] %vm213_vm1, %v1067_v50  ;;  %v1070_v53 = vadd.f32 %v1120_v49, %v1069_v52  ;;  %v1231_v54 = vpop.f32.mrb[23].mxu1 }
 0x6d8   :  { %1074 = vst.msk [vmem:[#allocation19 + $0x8] sm:$0xff] %vm213_vm1, %v1070_v53 }
 0x6d9   :  { %1590 = shalt.err (!%p1587_p0)
}
 0x6da   :  { %s1591_s11 = scalar_lea.hbm %s2030_s14, 256 }
 0x6db   :  { %p1592_p1 = scmp.ne.s32.totalorder %s2030_s14, %s1591_s11  ;;  %p1595_p2 = scmp.lt.u32.totalorder %s1591_s11, %s2030_s14 }
 0x6dd   :  { %p1597_p3 = pnand %p1595_p2, %p1592_p1 }
 0x6df   :  { %1600 = shalt.err (!%p1597_p3)
}
 0x6e0   :  { %1086 = dma.vmem_to_hbm [thread:$0]  %s1081_s22, 256, %s2030_s14, [#allocation4], %s1619_s1, %s1619_s1, %s1620_s30  }
 0x6e1   :  { %1613 = dma.done.wait [#allocation4], 256  }
 0x6e2   :  { %1614 = vsyncadd [#allocation4], 4294967040 }
 0x6e3   :  { %1090 = vsyncpa [#allocation3], 1 }
 0x6e4   :  { %1091 = vsyncpa [#allocation6], 1 }
 0x6e5   :  { %1092 = vsyncpa [#allocation9], 1 }
 0x6e6   :  { %1093 = vsyncpa [#allocation12], 1 }
 0x6e7   :  { %1094 = vsyncpa [#allocation15], 1 }
 0x6e8   :  { %1095 = vsyncpa [#allocation18], 1 }
 0x6e9   :  { %1096 = vsyncpa [#allocation4], 1 }

</bundles_post_ra>
